<compile_context>
chip_gen: v6e
topology: v6e:2x2x1
jax: 0.10.0
libtpu: 0.0.40
codegen_flags: <defaults>
</compile_context>

<pallas_src>
import functools

import jax
import jax.numpy as jnp
from jax.experimental import pallas as pl
from jax.experimental.pallas import tpu as pltpu

_LANE = 128
_SUBLANE = 8

# Kernel-buffer budget sized against v7x's 64 MiB per-TC VMEM (the tightest
# generation); v5e/v6e have 128 MiB so this is safe everywhere.
_VMEM_BUDGET = 32 * 1024 * 1024
_VMEM_LIMIT = 48 * 1024 * 1024


def _round_up(x, m):
    return ((x + m - 1) // m) * m


def _choose_kn_tiles(in_dim, out_dim, dtype_bytes, tm_hint):
    """Pick (tk, tn, k_pad, n_pad) from the layer dims only (batch-independent)."""
    k_pad = _round_up(in_dim, _LANE)
    n_pad = _round_up(out_dim, _LANE)
    # Prefer collapsing the whole contraction into one K tile (no accumulator
    # RMW, no init/finalize) whenever the (tm, K)/(K, tn) tiles fit the budget.
    tk = min(k_pad, 2048)
    tn = min(n_pad, 512)

    def footprint(tk_, tn_):
        # double-buffered x / w / bias tiles + double-buffered output tile
        return dtype_bytes * (2 * (tm_hint * tk_ + tk_ * tn_ + tn_) + 2 * tm_hint * tn_)

    while footprint(tk, tn) > _VMEM_BUDGET and tk > _LANE:
        tk = max(_LANE, _round_up(tk // 2, _LANE))
    while footprint(tk, tn) > _VMEM_BUDGET and tn > _LANE:
        tn = max(_LANE, _round_up(tn // 2, _LANE))

    # Re-round padded dims so they divide evenly into tiles (zero padding on
    # the contraction axis is exact; padded output cols are sliced off).
    k_pad = _round_up(k_pad, tk)
    n_pad = _round_up(n_pad, tn)
    return tk, tn, k_pad, n_pad


def _linear_kernel_fused(x_ref, w_ref, b_ref, o_ref):
    # Whole contraction in one tile: single MXU matmul, bias fused, no scratch.
    o_ref[...] = (
        jnp.dot(x_ref[...], w_ref[...], preferred_element_type=jnp.float32)
        + b_ref[...].astype(jnp.float32)
    ).astype(o_ref.dtype)


def _linear_kernel_ksplit(x_ref, w_ref, b_ref, o_ref):
    # K-split path: accumulate in f32 directly into the output tile, which is
    # resident across the K axis via the out_specs index map (no acc scratch).
    k = pl.program_id(2)

    @pl.when(k == 0)
    def _init():
        # Fold the bias into the accumulator init (exactly once per tile).
        o_ref[...] = jnp.broadcast_to(b_ref[...].astype(jnp.float32), o_ref.shape)

    o_ref[...] += jnp.dot(x_ref[...], w_ref[...], preferred_element_type=jnp.float32)


@functools.partial(jax.jit, static_argnames=("out_dim", "tk", "tn", "tm_hint"))
def _linear_forward(x, wp, bp, *, out_dim, tk, tn, tm_hint):
    """x: (B, In), wp: (K_pad, N_pad) pre-transposed+padded W, bp: (1, N_pad)."""
    B, in_dim = x.shape
    k_pad, n_pad = wp.shape

    m_pad = _round_up(B, _SUBLANE)
    tm = min(tm_hint, m_pad)
    m_pad = _round_up(m_pad, tm)

    # Pad x only when it is not already aligned (skip the extra HBM pass).
    if (m_pad, k_pad) != (B, in_dim):
        xp = jnp.pad(x, ((0, m_pad - B), (0, k_pad - in_dim)))
    else:
        xp = x

    m_tiles = m_pad // tm
    n_tiles = n_pad // tn
    k_tiles = k_pad // tk

    # Truthful traffic estimate: x is re-read once per N tile, W once per M
    # tile; output written once.
    out_itemsize = jnp.dtype(x.dtype).itemsize
    bytes_accessed = (
        xp.size * xp.dtype.itemsize * n_tiles
        + wp.size * wp.dtype.itemsize * m_tiles
        + bp.size * bp.dtype.itemsize * m_tiles
        + m_pad * n_pad * out_itemsize
    )
    cost = pl.CostEstimate(
        flops=2 * m_pad * k_pad * n_pad,
        transcendentals=0,
        bytes_accessed=bytes_accessed,
    )
    semantics = ("parallel", "parallel") + (("arbitrary",) if k_tiles > 1 else ())
    params = pltpu.CompilerParams(
        dimension_semantics=semantics,
        vmem_limit_bytes=_VMEM_LIMIT,
    )

    if k_tiles == 1:
        # N leads the grid: with a tiny batch (single M tile) the N axis is the
        # only parallel axis, so it must drive v7x's 2-TC sharding.
        out_p = pl.pallas_call(
            _linear_kernel_fused,
            out_shape=jax.ShapeDtypeStruct((m_pad, n_pad), x.dtype),
            grid_spec=pl.GridSpec(
                grid=(n_tiles, m_tiles),
                in_specs=[
                    pl.BlockSpec((tm, tk), lambda j, i: (i, 0)),
                    pl.BlockSpec((tk, tn), lambda j, i: (0, j)),
                    pl.BlockSpec((1, tn), lambda j, i: (0, j)),
                ],
                out_specs=pl.BlockSpec((tm, tn), lambda j, i: (i, j)),
            ),
            compiler_params=params,
            cost_estimate=cost,
        )(xp, wp, bp)
    else:
        # K-split: f32 output accumulated in place, cast after the kernel.
        out_p = pl.pallas_call(
            _linear_kernel_ksplit,
            out_shape=jax.ShapeDtypeStruct((m_pad, n_pad), jnp.float32),
            grid_spec=pl.GridSpec(
                grid=(n_tiles, m_tiles, k_tiles),
                in_specs=[
                    pl.BlockSpec((tm, tk), lambda j, i, k: (i, k)),
                    pl.BlockSpec((tk, tn), lambda j, i, k: (k, j)),
                    pl.BlockSpec((1, tn), lambda j, i, k: (0, j)),
                ],
                out_specs=pl.BlockSpec((tm, tn), lambda j, i, k: (i, j)),
            ),
            compiler_params=params,
            cost_estimate=cost,
        )(xp, wp, bp)
        out_p = out_p.astype(x.dtype)

    # Slice the padding back off.
    return out_p[:B, :out_dim]


class PallasLinear:
    """Pallas-backed equivalent of torch.nn.Linear(inputSize, outputSize)."""

    def __init__(self, weight, bias, tm_hint=256):
        out_dim, in_dim = weight.shape
        assert bias.shape == (out_dim,)
        tk, tn, k_pad, n_pad = _choose_kn_tiles(
            in_dim, out_dim, jnp.dtype(weight.dtype).itemsize, tm_hint
        )
        self.out_dim = out_dim
        self.tk, self.tn, self.tm_hint = tk, tn, tm_hint
        # Pre-transpose + pad the torch-layout (Out, In) weight ONCE, outside
        # the per-call jit path: (Out, In) -> (In_pad, Out_pad).
        self.wp = jnp.pad(weight.T, ((0, k_pad - in_dim), (0, n_pad - out_dim)))
        self.bp = jnp.pad(bias, (0, n_pad - out_dim)).reshape(1, n_pad)

    def __call__(self, x):
        return _linear_forward(
            x, self.wp, self.bp,
            out_dim=self.out_dim, tk=self.tk, tn=self.tn, tm_hint=self.tm_hint,
        )


if __name__ == "__main__":
    # Small shapes consistent with the module: inputSize=32, outputSize=16, batch=8.
    batch, input_size, output_size = 8, 32, 16

    key = jax.random.PRNGKey(0)
    kx, kw, kb = jax.random.split(key, 3)

    x = jax.random.normal(kx, (batch, input_size), dtype=jnp.float32)
    # Deterministic init mimicking torch.nn.Linear's uniform(-1/sqrt(In), 1/sqrt(In)).
    bound = 1.0 / jnp.sqrt(jnp.float32(input_size))
    weight = jax.random.uniform(
        kw, (output_size, input_size), minval=-bound, maxval=bound, dtype=jnp.float32
    )
    bias = jax.random.uniform(
        kb, (output_size,), minval=-bound, maxval=bound, dtype=jnp.float32
    )

    model = PallasLinear(weight, bias)
    out = jax.block_until_ready(model(x))

    # Reference check against plain JAX (same math as torch Linear).
    ref = x @ weight.T + bias
    assert out.shape == (batch, output_size)
    assert jnp.allclose(out, ref, atol=1e-5, rtol=1e-5)

    print("KERNEL_OK")
</pallas_src>

<mosaic_0001>
module attributes {stable_mosaic.version = 11 : i64} {
  func.func @_linear_kernel_fused(%arg0: i32, %arg1: i32, %arg2: memref<8x128xf32, #tpu.memory_space<vmem>>, %arg3: memref<128x128xf32, #tpu.memory_space<vmem>>, %arg4: memref<1x128xf32, #tpu.memory_space<vmem>>, %arg5: memref<8x128xf32, #tpu.memory_space<vmem>>) attributes {dimension_semantics = [#tpu.dimension_semantics<parallel>, #tpu.dimension_semantics<parallel>], iteration_bounds = array<i64: 1, 1>, scalar_prefetch = 0 : i64, scratch_operands = 0 : i64, tpu.core_type = #tpu.core_type<tc>, window_params = [{transform_indices = @transform_0, window_bounds = array<i64: 8, 128>}, {transform_indices = @transform_1, window_bounds = array<i64: 128, 128>}, {transform_indices = @transform_2, window_bounds = array<i64: 1, 128>}, {transform_indices = @transform_3, window_bounds = array<i64: 8, 128>}]} {
    %c0 = arith.constant 0 : index
    %c0_0 = arith.constant 0 : index
    %0 = vector.load %arg2[%c0, %c0_0] : memref<8x128xf32, #tpu.memory_space<vmem>>, vector<8x128xf32>
    %c0_1 = arith.constant 0 : index
    %c0_2 = arith.constant 0 : index
    %1 = vector.load %arg3[%c0_1, %c0_2] : memref<128x128xf32, #tpu.memory_space<vmem>>, vector<128x128xf32>
    %cst = arith.constant dense<0.000000e+00> : vector<8x128xf32>
    %2 = tpu.matmul %0, %1, %cst {dimension_numbers = #tpu.dot_dimension_numbers<[1], [0], [0], [1], [0, 0, 1, 1], [], []>} : vector<8x128xf32>, vector<128x128xf32>, vector<8x128xf32> -> vector<8x128xf32>
    %c0_3 = arith.constant 0 : index
    %c0_4 = arith.constant 0 : index
    %3 = vector.load %arg4[%c0_3, %c0_4] : memref<1x128xf32, #tpu.memory_space<vmem>>, vector<1x128xf32>
    %4 = vector.broadcast %3 : vector<1x128xf32> to vector<8x128xf32>
    %5 = arith.addf %2, %4 : vector<8x128xf32>
    %c0_5 = arith.constant 0 : index
    %c0_6 = arith.constant 0 : index
    %6 = vector.load %arg5[%c0_5, %c0_6] : memref<8x128xf32, #tpu.memory_space<vmem>>, vector<8x128xf32>
    tpu.vector_store %arg5[%c0_5, %c0_6], %5 {strides = array<i32>} : memref<8x128xf32, #tpu.memory_space<vmem>>, vector<8x128xf32>,
    return
  }
  func.func @transform_0(%arg0: i32, %arg1: i32) -> (i32, i32) {
    %c0_i32 = arith.constant 0 : i32
    %c0_i32_0 = arith.constant 0 : i32
    return %arg1, %c0_i32 : i32, i32
  }
  func.func @transform_1(%arg0: i32, %arg1: i32) -> (i32, i32) {
    %c0_i32 = arith.constant 0 : i32
    %c0_i32_0 = arith.constant 0 : i32
    return %c0_i32, %arg0 : i32, i32
  }
  func.func @transform_2(%arg0: i32, %arg1: i32) -> (i32, i32) {
    %c0_i32 = arith.constant 0 : i32
    %c0_i32_0 = arith.constant 0 : i32
    return %c0_i32, %arg0 : i32, i32
  }
  func.func @transform_3(%arg0: i32, %arg1: i32) -> (i32, i32) {
    %c0_i32 = arith.constant 0 : i32
    return %arg1, %arg0 : i32, i32
  }
}

</mosaic_0001>

<bundles_post_ra>
// kernel: _linear_forward.1
= control target key start
LH: loop header
LB: loop body
LE: loop exit
PB: predicated region body
PF: predicated region fallthrough
CT: control target
= control target key end

     0   :  { %8 = vsyncpa [#allocation3], 0  ;;  %s280_s0 = inlined_call_operand.vmem [shape: f32[8,128], index: 0, kind: input, shape index: {}]   ;;  %s281_s1 = inlined_call_operand.hbm [shape: f32[128,128], index: 1, kind: input, shape index: {}]   ;;  %s282_s2 = inlined_call_operand.vmem [shape: f32[1,128], index: 2, kind: input, shape index: {}]   ;;  %s283_s3 = inlined_call_operand.hbm [shape: f32[8,128], index: 3, kind: output, shape index: {}]  }
   0x1   :  { %9 = vsyncpa [#allocation4], 0  ;;  %s242_s12 = smov [#allocation2]  }
   0x2   :  { %s17_s13 = sshll.u32 %s242_s12, 4  ;;  %s18_s13 = int_to_ptr.vmem [resolvable:$true] %s17_s13 }
   0x3   :  { %s206_s14 = scalar_lea.vmem %s18_s13, 2048  ;;  %p211_p1 = scmp.lt.s32.totalorder %s18_s13, %s18_s13 }
   0x4   :  { %p207_p0 = scmp.ne.s32.totalorder %s18_s13, %s206_s14  ;;  %p212_p2 = scmp.lt.s32.totalorder %s206_s14, %s206_s14 }
   0x6   :  { %p213_p3 = por %p212_p2, %p211_p1 }
   0x8   :  { %p214_p4 = pnand %p213_p3, %p207_p0 }
   0xa   :  { %217 = shalt.err (!%p214_p4)
}
   0xb   :  { %s243_s15 = smov 128   ;;  %s244_s16 = smov 8  }
   0xc   :  { %23 = dma.hbm_to_vmem [thread:$0]  %s281_s1, 2048, %s18_s13, [#allocation3], %s243_s15, %s243_s15, %s244_s16  }
   0xd   :  { %238 = dma.done.wait [#allocation3], 2048  }
   0xe   :  { %239 = vsyncadd [#allocation3], 4294965248  ;;  %v245_v0 = vmov 0.0   ;;  %vm246_vm0 = vmmov 0   ;;  %v45_v1 = vld [vmem:[#allocation2 + $0x78] sm:$0xff]  ;;  %v44_v2 = vld [vmem:[#allocation2 + $0x70] sm:$0xff] }
   0xf   :  { %157 = vmatprep.subr.mxu0 %v245_v0  ;;  %189 = vmatprep.mubr.msk.f32.mxu0 %vm246_vm0, %v245_v0  ;;  %v43_v3 = vld [vmem:[#allocation2 + $0x68] sm:$0xff]  ;;  %v42_v4 = vld [vmem:[#allocation2 + $0x60] sm:$0xff]  ;;  %v41_v5 = vld [vmem:[#allocation2 + $0x58] sm:$0xff]  ;;  %s247_s22 = smov [#allocation5]  }
  0x10   :  { %158 = vmatpush3.msra.mxu0 %v45_v1  ;;  %v40_v6 = vld [vmem:[#allocation2 + $0x50] sm:$0xff]  ;;  %v39_v7 = vld [vmem:[#allocation2 + $0x48] sm:$0xff]  ;;  %v38_v8 = vld [vmem:[#allocation2 + $0x40] sm:$0xff]  ;;  %s130_s23 = sshll.u32 %s247_s22, 4  ;;  %s131_s23 = int_to_ptr.vmem [resolvable:$true] %s130_s23 }
  0x11   :  { %159 = vmatprep.subr.mxu0 %v245_v0  ;;  %v37_v9 = vld [vmem:[#allocation2 + $0x38] sm:$0xff]  ;;  %v36_v10 = vld [vmem:[#allocation2 + $0x30] sm:$0xff]  ;;  %v35_v11 = vld [vmem:[#allocation2 + $0x28] sm:$0xff]  ;;  %s218_s24 = scalar_lea.vmem %s131_s23, 128  ;;  %p223_p6 = scmp.lt.s32.totalorder %s131_s23, %s131_s23 }
  0x12   :  { %160 = vmatpush3.msra.mxu0 %v44_v2  ;;  %v34_v12 = vld [vmem:[#allocation2 + $0x20] sm:$0xff]  ;;  %v33_v13 = vld [vmem:[#allocation2 + $0x18] sm:$0xff]  ;;  %v32_v14 = vld [vmem:[#allocation2 + $0x10] sm:$0xff]  ;;  %p219_p5 = scmp.ne.s32.totalorder %s131_s23, %s218_s24  ;;  %p224_p7 = scmp.lt.s32.totalorder %s218_s24, %s218_s24 }
  0x13   :  { %161 = vmatprep.subr.mxu0 %v245_v0  ;;  %v31_v15 = vld [vmem:[#allocation2 + $0x8] sm:$0xff]  ;;  %v30_v16 = vld [vmem:[#allocation2] sm:$0xff] }
  0x14   :  { %162 = vmatpush3.msra.mxu0 %v43_v3  ;;  %v29_v17 = vld [vmem:[%s280_s0] sm:$0xff]  ;;  %p225_p8 = por %p224_p7, %p223_p6 }
  0x15   :  { %163 = vmatprep.subr.mxu0 %v245_v0  ;;  %v139_v18 = vld [vmem:[%s282_s2] ss:$0 sm:$0xff] }
  0x16   :  { %164 = vmatpush3.msra.mxu0 %v42_v4  ;;  %p226_p9 = pnand %p225_p8, %p219_p5 }
  0x17   :  { %165 = vmatprep.subr.mxu0 %v245_v0 }
  0x18   :  { %166 = vmatpush3.msra.mxu0 %v41_v5 }
  0x19   :  { %167 = vmatprep.subr.mxu0 %v245_v0 }
  0x1a   :  { %168 = vmatpush3.msra.mxu0 %v40_v6 }
  0x1b   :  { %169 = vmatprep.subr.mxu0 %v245_v0 }
  0x1c   :  { %170 = vmatpush3.msra.mxu0 %v39_v7 }
  0x1d   :  { %171 = vmatprep.subr.mxu0 %v245_v0 }
  0x1e   :  { %172 = vmatpush3.msra.mxu0 %v38_v8 }
  0x1f   :  { %173 = vmatprep.subr.mxu0 %v245_v0 }
  0x20   :  { %174 = vmatpush3.msra.mxu0 %v37_v9 }
  0x21   :  { %175 = vmatprep.subr.mxu0 %v245_v0 }
  0x22   :  { %176 = vmatpush3.msra.mxu0 %v36_v10 }
  0x23   :  { %177 = vmatprep.subr.mxu0 %v245_v0 }
  0x24   :  { %178 = vmatpush3.msra.mxu0 %v35_v11 }
  0x25   :  { %179 = vmatprep.subr.mxu0 %v245_v0 }
  0x26   :  { %180 = vmatpush3.msra.mxu0 %v34_v12 }
  0x27   :  { %181 = vmatprep.subr.mxu0 %v245_v0 }
  0x28   :  { %182 = vmatpush3.msra.mxu0 %v33_v13 }
  0x29   :  { %183 = vmatprep.subr.mxu0 %v245_v0 }
  0x2a   :  { %184 = vmatpush3.msra.mxu0 %v32_v14 }
  0x2b   :  { %185 = vmatprep.subr.mxu0 %v245_v0 }
  0x2c   :  { %186 = vmatpush3.msra.mxu0 %v31_v15 }
  0x2d   :  { %187 = vmatprep.subr.mxu0 %v245_v0 }
  0x2e   :  { %188 = vmatpush3.msra.mxu0 %v30_v16 }
  0x2f   :  { %190 = vmatmul.mubr.f32.vlgmr.msra.gmra.mxu0 %v29_v17 }
  0xef   :  { %v119_v19 = vpop.f32.mrf.mxu0 }
  0xf0   :  { %v120_v20 = vadd.f32 %v139_v18, %v119_v19 }
  0xf1   :  { %v191_v21 = vpop.f32.mrf.mxu0 }
  0xf2   :  { %123 = vst [vmem:[#allocation5] sm:$0xff] %v120_v20 }
  0xf3   :  { %229 = shalt.err (!%p226_p9)
}
  0xf4   :  { %133 = dma.vmem_to_hbm [thread:$0]  %s131_s23, 128, %s283_s3, [#allocation4]  }
  0xf5   :  { %240 = dma.done.wait [#allocation4], 128  }
  0xf6   :  { %241 = vsyncadd [#allocation4], 4294967168 }
  0xf7   :  { %137 = vsyncpa [#allocation3], 1 }
  0xf8   :  { %138 = vsyncpa [#allocation4], 1 }

</bundles_post_ra>
